<compile_context>
chip_gen: v5e
topology: v5e:2x2
jax: 0.10.0
libtpu: 0.0.40
codegen_flags: <defaults>
</compile_context>

<pallas_src>
import numpy as np

import jax
import jax.numpy as jnp
from jax import lax
from jax.experimental import pallas as pl
from jax.experimental.pallas import tpu as pltpu


# ---------------------------------------------------------------------------
# Beta schedule ("ours") — identical math to the PyTorch reference.
# ---------------------------------------------------------------------------
def betas_for_alpha_bar2(num_diffusion_timesteps, alpha_bar, max_beta=0.999):
    betas = [min(1 - alpha_bar(0), max_beta)]
    for i in range(num_diffusion_timesteps - 1):
        t1 = i / num_diffusion_timesteps
        t2 = (i + 1) / num_diffusion_timesteps
        betas.append(min(1 - alpha_bar(t2) / alpha_bar(t1), max_beta))
    return np.array(betas)


def make_schedule(timesteps):
    betas = betas_for_alpha_bar2(
        timesteps, lambda t: np.cos((t + 1) / (1 + 1) * np.pi / 2) ** 2
    )
    alphas = 1.0 - betas
    alphas_cumprod = np.cumprod(alphas, axis=0)
    sqrt_alphas_cumprod = np.sqrt(alphas_cumprod).astype(np.float32)
    sqrt_one_minus_alphas_cumprod = np.sqrt(1.0 - alphas_cumprod).astype(np.float32)
    return jnp.asarray(sqrt_alphas_cumprod), jnp.asarray(sqrt_one_minus_alphas_cumprod)


# ---------------------------------------------------------------------------
# Pallas kernel: one grid program per BB-row batch block.
#   q_sample -> single fused denoiser MLP over (history + noisy future)
#            -> L1 loss -> lane-dense partial-sum slab.
# ---------------------------------------------------------------------------
def make_diffusion_loss_kernel(t_his, t_pred):
    def diffusion_loss_kernel(
        coef_ref,   # VMEM (BB, 128)          f32  lane0 = sqrt(a_cum[t]), lane1 = sqrt(1-a_cum[t])
        cm_ref,     # VMEM (BB, t_total, nc)  f32  complete motion (history + future)
        nz_ref,     # VMEM (BB, t_pred, nc)   f32  noise
        temb_ref,   # VMEM (BB, hidden)       f32  per-batch time embedding
        w1_ref,     # VMEM (nc, hidden)       bf16
        b1_ref,     # VMEM (1, hidden)        f32
        w2_ref,     # VMEM (hidden, nc)       bf16
        b2_ref,     # VMEM (1, nc)            f32
        out_ref,    # VMEM (BB, 128)          f32  lane0 = his L1 sum, lane1 = pre L1 sum
        xall_ref,   # VMEM scratch (BB, t_total, nc) f32  model input
    ):
        bb, t_total, nc = cm_ref.shape

        # q_sample (f32): x_t = sqrt(a_cum[t]) * x0 + sqrt(1 - a_cum[t]) * eps
        # History rows pass through unchanged; noisy future rows written into
        # the scratch next to them (no concat, single model call).
        c1 = coef_ref[:, 0:1][:, :, None]                         # (BB, 1, 1)
        c2 = coef_ref[:, 1:2][:, :, None]                         # (BB, 1, 1)
        xall_ref[...] = cm_ref[...]
        xall_ref[:, t_his:, :] = c1 * cm_ref[:, t_his:, :] + c2 * nz_ref[...]

        # Synthetic denoiser: single 2-layer MLP over all BB*t_total rows.
        x2 = xall_ref[...].reshape(bb * t_total, nc).astype(jnp.bfloat16)
        h = jnp.dot(x2, w1_ref[...], preferred_element_type=jnp.float32)
        h = h.reshape(bb, t_total, -1) + b1_ref[...] + temb_ref[...][:, None, :]
        h = jnp.maximum(h, 0.0).reshape(bb * t_total, -1).astype(jnp.bfloat16)
        out = jnp.dot(h, w2_ref[...], preferred_element_type=jnp.float32) + b2_ref[...]
        out = out.reshape(bb, t_total, nc)                        # (BB, t_total, nc) f32

        # L1 against target = cat(raw history, x_start) == complete_motion.
        loss = jnp.abs(out - cm_ref[...])                         # (BB, t_total, nc) f32
        his_sum = jnp.sum(jnp.sum(loss[:, :t_his, :], axis=2, keepdims=True), axis=1)  # (BB,1)
        pre_sum = jnp.sum(jnp.sum(loss[:, t_his:, :], axis=2, keepdims=True), axis=1)  # (BB,1)

        # Single lane-dense store: lane 0 = his sum, lane 1 = pre sum, rest 0.
        lane = lax.broadcasted_iota(jnp.int32, (bb, 128), 1)
        out_ref[...] = jnp.where(lane == 0, his_sum,
                                 jnp.where(lane == 1, pre_sum, 0.0))

    return diffusion_loss_kernel


# ---------------------------------------------------------------------------
# Wrapper: schedule gather, time-embedding gather, pallas_call, final means.
# ---------------------------------------------------------------------------
def gaussian_diffusion_forward(
    complete_motion,   # (b, t_total, nc) float32
    t,                 # (b,) int32 timesteps
    noise,             # (b, t_pred, nc) float32
    params,            # dict of synthetic model params
    schedule,          # (sqrt_alphas_cumprod, sqrt_one_minus_alphas_cumprod)
    t_pred,
    history_weight=1.0,
    future_weight=20.0,
):
    b, t_total, nc = complete_motion.shape
    t_his = t_total - t_pred
    hidden = params["w1"].shape[1]

    # Batch rows per grid step: fold the whole (small) batch, else 8-row blocks.
    bb = b if b <= 8 else 8
    assert b % bb == 0, "batch must be divisible by the per-step batch block"
    nb = b // bb

    sqrt_ac, sqrt_omac = schedule
    c1 = jnp.take(sqrt_ac, t).astype(jnp.float32)      # (b,)  extract(...)
    c2 = jnp.take(sqrt_omac, t).astype(jnp.float32)    # (b,)
    # Lane-dense coefficient slab: lane0=c1, lane1=c2, rest zero.
    coef = jnp.zeros((b, 128), jnp.float32).at[:, 0].set(c1).at[:, 1].set(c2)

    temb = jnp.take(params["time_emb"], t, axis=0).astype(jnp.float32)   # (b, hidden)

    # bf16 MXU operands (accumulate in f32 inside the kernel).
    w1 = params["w1"].astype(jnp.bfloat16)
    w2 = params["w2"].astype(jnp.bfloat16)
    b1 = params["b1"].astype(jnp.float32)
    b2 = params["b2"].astype(jnp.float32)

    kernel = make_diffusion_loss_kernel(t_his, t_pred)

    sums = pl.pallas_call(
        kernel,
        out_shape=jax.ShapeDtypeStruct((b, 128), jnp.float32),
        grid_spec=pltpu.PrefetchScalarGridSpec(
            num_scalar_prefetch=0,
            grid=(nb,),
            in_specs=[
                pl.BlockSpec((bb, 128), lambda i: (i, 0)),             # coef slab
                pl.BlockSpec((bb, t_total, nc), lambda i: (i, 0, 0)),  # complete motion
                pl.BlockSpec((bb, t_pred, nc), lambda i: (i, 0, 0)),   # noise
                pl.BlockSpec((bb, hidden), lambda i: (i, 0)),          # time embedding
                pl.BlockSpec((nc, hidden), lambda i: (0, 0)),          # W1 (bf16)
                pl.BlockSpec((1, hidden), lambda i: (0, 0)),           # b1
                pl.BlockSpec((hidden, nc), lambda i: (0, 0)),          # W2 (bf16)
                pl.BlockSpec((1, nc), lambda i: (0, 0)),               # b2
            ],
            out_specs=pl.BlockSpec((bb, 128), lambda i: (i, 0)),
            scratch_shapes=[pltpu.VMEM((bb, t_total, nc), jnp.float32)],
        ),
        compiler_params=pltpu.CompilerParams(
            dimension_semantics=("parallel",),          # shard batch axis across TCs (v7x)
            vmem_limit_bytes=32 * 1024 * 1024,
        ),
    )(coef, complete_motion, noise, temb, w1, b1, w2, b2)

    # Equal element counts per batch => mean-of-per-batch-means == global mean.
    his_loss = jnp.sum(sums[:, 0]) / float(b * t_his * nc)
    # div_k = 1 => min over k is identity; global mean over (b, t_pred, nc).
    pre_loss = jnp.sum(sums[:, 1]) / float(b * t_pred * nc)

    total_loss = history_weight * his_loss + future_weight * pre_loss
    extra = {"his_loss": history_weight * his_loss, "pre_loss": future_weight * pre_loss}
    return total_loss, extra


# ---------------------------------------------------------------------------
# Main
# ---------------------------------------------------------------------------
if __name__ == "__main__":
    # Small shapes consistent with the module: motion sequences [b, t_total, nc].
    B = 2
    T_HIS = 8
    T_PRED = 8
    T_TOTAL = T_HIS + T_PRED
    NC = 32
    HIDDEN = 128          # lane-dense hidden width
    TIMESTEPS = 50

    key = jax.random.PRNGKey(0)
    k_motion, k_t, k_noise, k_w1, k_b1, k_w2, k_b2, k_temb = jax.random.split(key, 8)

    complete_motion = jax.random.normal(k_motion, (B, T_TOTAL, NC), dtype=jnp.float32)
    t = jax.random.randint(k_t, (B,), 0, TIMESTEPS, dtype=jnp.int32)
    noise = jax.random.normal(k_noise, (B, T_PRED, NC), dtype=jnp.float32)

    # Deterministic synthetic denoiser parameters.
    params = {
        "w1": jax.random.normal(k_w1, (NC, HIDDEN), dtype=jnp.float32) * 0.05,
        "b1": jax.random.normal(k_b1, (1, HIDDEN), dtype=jnp.float32) * 0.01,
        "w2": jax.random.normal(k_w2, (HIDDEN, NC), dtype=jnp.float32) * 0.05,
        "b2": jax.random.normal(k_b2, (1, NC), dtype=jnp.float32) * 0.01,
        "time_emb": jax.random.normal(k_temb, (TIMESTEPS, HIDDEN), dtype=jnp.float32) * 0.05,
    }

    schedule = make_schedule(TIMESTEPS)

    # TODO(synk): inner denoiser `self.model` is an external nn.Module not defined
    # in GaussianDiffusion; a deterministic synthetic MLP is used in its place.
    total_loss, extra = gaussian_diffusion_forward(
        complete_motion, t, noise, params, schedule,
        t_pred=T_PRED, history_weight=1.0, future_weight=20.0,
    )
    total_loss = jax.block_until_ready(total_loss)
    assert jnp.isfinite(total_loss)
    print("KERNEL_OK")
</pallas_src>

<mosaic_0001>
module attributes {stable_mosaic.version = 11 : i64} {
  func.func @diffusion_loss_kernel(%arg0: i32, %arg1: memref<2x128xf32, #tpu.memory_space<vmem>>, %arg2: memref<2x16x32xf32, #tpu.memory_space<vmem>>, %arg3: memref<2x8x32xf32, #tpu.memory_space<vmem>>, %arg4: memref<2x128xf32, #tpu.memory_space<vmem>>, %arg5: memref<32x128xbf16, #tpu.memory_space<vmem>>, %arg6: memref<1x128xf32, #tpu.memory_space<vmem>>, %arg7: memref<128x32xbf16, #tpu.memory_space<vmem>>, %arg8: memref<1x32xf32, #tpu.memory_space<vmem>>, %arg9: memref<2x128xf32, #tpu.memory_space<vmem>>, %arg10: memref<2x16x32xf32, #tpu.memory_space<vmem>>) attributes {dimension_semantics = [#tpu.dimension_semantics<parallel>], iteration_bounds = array<i64: 1>, scalar_prefetch = 0 : i64, scratch_operands = 1 : i64, tpu.core_type = #tpu.core_type<tc>, window_params = [{transform_indices = @transform_0, window_bounds = array<i64: 2, 128>}, {transform_indices = @transform_1, window_bounds = array<i64: 2, 16, 32>}, {transform_indices = @transform_2, window_bounds = array<i64: 2, 8, 32>}, {transform_indices = @transform_3, window_bounds = array<i64: 2, 128>}, {pipeline_mode = #tpu.pipeline_mode<synchronous>, transform_indices = @transform_4, window_bounds = array<i64: 32, 128>}, {pipeline_mode = #tpu.pipeline_mode<synchronous>, transform_indices = @transform_5, window_bounds = array<i64: 1, 128>}, {pipeline_mode = #tpu.pipeline_mode<synchronous>, transform_indices = @transform_6, window_bounds = array<i64: 128, 32>}, {pipeline_mode = #tpu.pipeline_mode<synchronous>, transform_indices = @transform_7, window_bounds = array<i64: 1, 32>}, {transform_indices = @transform_8, window_bounds = array<i64: 2, 128>}]} {
    %c0 = arith.constant 0 : index
    %c0_0 = arith.constant 0 : index
    %0 = vector.load %arg1[%c0, %c0_0] : memref<2x128xf32, #tpu.memory_space<vmem>>, vector<2x1xf32>
    %1 = vector.shape_cast %0 : vector<2x1xf32> to vector<2x1x1xf32>
    %c0_1 = arith.constant 0 : index
    %c1 = arith.constant 1 : index
    %2 = vector.load %arg1[%c0_1, %c1] : memref<2x128xf32, #tpu.memory_space<vmem>>, vector<2x1xf32>
    %3 = vector.shape_cast %2 : vector<2x1xf32> to vector<2x1x1xf32>
    %c0_2 = arith.constant 0 : index
    %c0_3 = arith.constant 0 : index
    %c0_4 = arith.constant 0 : index
    %4 = vector.load %arg2[%c0_2, %c0_3, %c0_4] : memref<2x16x32xf32, #tpu.memory_space<vmem>>, vector<2x16x32xf32>
    %c0_5 = arith.constant 0 : index
    %c0_6 = arith.constant 0 : index
    %c0_7 = arith.constant 0 : index
    %5 = vector.load %arg10[%c0_5, %c0_6, %c0_7] : memref<2x16x32xf32, #tpu.memory_space<vmem>>, vector<2x16x32xf32>
    tpu.vector_store %arg10[%c0_5, %c0_6, %c0_7], %4 {strides = array<i32>} : memref<2x16x32xf32, #tpu.memory_space<vmem>>, vector<2x16x32xf32>,
    %c0_8 = arith.constant 0 : index
    %c8 = arith.constant 8 : index
    %c0_9 = arith.constant 0 : index
    %6 = vector.load %arg2[%c0_8, %c8, %c0_9] : memref<2x16x32xf32, #tpu.memory_space<vmem>>, vector<2x8x32xf32>
    %7 = vector.broadcast %1 : vector<2x1x1xf32> to vector<2x8x32xf32>
    %8 = arith.mulf %7, %6 : vector<2x8x32xf32>
    %c0_10 = arith.constant 0 : index
    %c0_11 = arith.constant 0 : index
    %c0_12 = arith.constant 0 : index
    %9 = vector.load %arg3[%c0_10, %c0_11, %c0_12] : memref<2x8x32xf32, #tpu.memory_space<vmem>>, vector<2x8x32xf32>
    %10 = vector.broadcast %3 : vector<2x1x1xf32> to vector<2x8x32xf32>
    %11 = arith.mulf %10, %9 : vector<2x8x32xf32>
    %12 = arith.addf %8, %11 : vector<2x8x32xf32>
    %c0_13 = arith.constant 0 : index
    %c8_14 = arith.constant 8 : index
    %c0_15 = arith.constant 0 : index
    %13 = vector.load %arg10[%c0_13, %c8_14, %c0_15] : memref<2x16x32xf32, #tpu.memory_space<vmem>>, vector<2x8x32xf32>
    tpu.vector_store %arg10[%c0_13, %c8_14, %c0_15], %12 {strides = array<i32>} : memref<2x16x32xf32, #tpu.memory_space<vmem>>, vector<2x8x32xf32>,
    %c0_16 = arith.constant 0 : index
    %c0_17 = arith.constant 0 : index
    %c0_18 = arith.constant 0 : index
    %14 = vector.load %arg10[%c0_16, %c0_17, %c0_18] : memref<2x16x32xf32, #tpu.memory_space<vmem>>, vector<2x16x32xf32>
    %15 = vector.shape_cast %14 : vector<2x16x32xf32> to vector<32x32xf32>
    %16 = arith.truncf %15 : vector<32x32xf32> to vector<32x32xbf16>
    %c0_19 = arith.constant 0 : index
    %c0_20 = arith.constant 0 : index
    %17 = vector.load %arg5[%c0_19, %c0_20] : memref<32x128xbf16, #tpu.memory_space<vmem>>, vector<32x128xbf16>
    %cst = arith.constant dense<0.000000e+00> : vector<32x128xf32>
    %18 = tpu.matmul %16, %17, %cst {dimension_numbers = #tpu.dot_dimension_numbers<[1], [0], [0], [1], [0, 0, 1, 1], [], []>} : vector<32x32xbf16>, vector<32x128xbf16>, vector<32x128xf32> -> vector<32x128xf32>
    %19 = vector.shape_cast %18 : vector<32x128xf32> to vector<2x16x128xf32>
    %c0_21 = arith.constant 0 : index
    %c0_22 = arith.constant 0 : index
    %20 = vector.load %arg6[%c0_21, %c0_22] : memref<1x128xf32, #tpu.memory_space<vmem>>, vector<1x128xf32>
    %21 = vector.shape_cast %20 : vector<1x128xf32> to vector<1x1x128xf32>
    %22 = vector.broadcast %21 : vector<1x1x128xf32> to vector<2x16x128xf32>
    %23 = arith.addf %19, %22 : vector<2x16x128xf32>
    %c0_23 = arith.constant 0 : index
    %c0_24 = arith.constant 0 : index
    %24 = vector.load %arg4[%c0_23, %c0_24] : memref<2x128xf32, #tpu.memory_space<vmem>>, vector<2x128xf32>
    %25 = vector.shape_cast %24 : vector<2x128xf32> to vector<2x1x128xf32>
    %26 = vector.broadcast %25 : vector<2x1x128xf32> to vector<2x16x128xf32>
    %27 = arith.addf %23, %26 : vector<2x16x128xf32>
    %cst_25 = arith.constant 0.000000e+00 : f32
    %28 = vector.broadcast %cst_25 : f32 to vector<2x16x128xf32>
    %29 = arith.maximumf %27, %28 : vector<2x16x128xf32>
    %30 = vector.shape_cast %29 : vector<2x16x128xf32> to vector<32x128xf32>
    %31 = arith.truncf %30 : vector<32x128xf32> to vector<32x128xbf16>
    %c0_26 = arith.constant 0 : index
    %c0_27 = arith.constant 0 : index
    %32 = vector.load %arg7[%c0_26, %c0_27] : memref<128x32xbf16, #tpu.memory_space<vmem>>, vector<128x32xbf16>
    %cst_28 = arith.constant dense<0.000000e+00> : vector<32x32xf32>
    %33 = tpu.matmul %31, %32, %cst_28 {dimension_numbers = #tpu.dot_dimension_numbers<[1], [0], [0], [1], [0, 0, 1, 1], [], []>} : vector<32x128xbf16>, vector<128x32xbf16>, vector<32x32xf32> -> vector<32x32xf32>
    %c0_29 = arith.constant 0 : index
    %c0_30 = arith.constant 0 : index
    %34 = vector.load %arg8[%c0_29, %c0_30] : memref<1x32xf32, #tpu.memory_space<vmem>>, vector<1x32xf32>
    %35 = vector.broadcast %34 : vector<1x32xf32> to vector<32x32xf32>
    %36 = arith.addf %33, %35 : vector<32x32xf32>
    %37 = vector.shape_cast %36 : vector<32x32xf32> to vector<2x16x32xf32>
    %c0_31 = arith.constant 0 : index
    %c0_32 = arith.constant 0 : index
    %c0_33 = arith.constant 0 : index
    %38 = vector.load %arg2[%c0_31, %c0_32, %c0_33] : memref<2x16x32xf32, #tpu.memory_space<vmem>>, vector<2x16x32xf32>
    %39 = arith.subf %37, %38 : vector<2x16x32xf32>
    %40 = math.absf %39 : vector<2x16x32xf32>
    %41 = vector.extract_strided_slice %40 {offsets = [0, 0, 0], sizes = [2, 8, 32], strides = [1, 1, 1]} : vector<2x16x32xf32> to vector<2x8x32xf32>
    %cst_34 = arith.constant dense<0.000000e+00> : vector<2x8xf32>
    %42 = vector.multi_reduction <add>, %41, %cst_34 [2] : vector<2x8x32xf32> to vector<2x8xf32>
    %43 = vector.shape_cast %42 : vector<2x8xf32> to vector<2x8x1xf32>
    %cst_35 = arith.constant dense<0.000000e+00> : vector<2x1xf32>
    %44 = vector.multi_reduction <add>, %43, %cst_35 [1] : vector<2x8x1xf32> to vector<2x1xf32>
    %45 = vector.extract_strided_slice %40 {offsets = [0, 8, 0], sizes = [2, 8, 32], strides = [1, 1, 1]} : vector<2x16x32xf32> to vector<2x8x32xf32>
    %cst_36 = arith.constant dense<0.000000e+00> : vector<2x8xf32>
    %46 = vector.multi_reduction <add>, %45, %cst_36 [2] : vector<2x8x32xf32> to vector<2x8xf32>
    %47 = vector.shape_cast %46 : vector<2x8xf32> to vector<2x8x1xf32>
    %cst_37 = arith.constant dense<0.000000e+00> : vector<2x1xf32>
    %48 = vector.multi_reduction <add>, %47, %cst_37 [1] : vector<2x8x1xf32> to vector<2x1xf32>
    %49 = tpu.iota {dimensions = array<i32: 1>} : vector<2x128xi32>
    %c0_i32 = arith.constant 0 : i32
    %50 = vector.broadcast %c0_i32 : i32 to vector<2x128xi32>
    %51 = arith.cmpi eq, %49, %50 : vector<2x128xi32>
    %c1_i32 = arith.constant 1 : i32
    %52 = vector.broadcast %c1_i32 : i32 to vector<2x128xi32>
    %53 = arith.cmpi eq, %49, %52 : vector<2x128xi32>
    %cst_38 = arith.constant 0.000000e+00 : f32
    %54 = vector.shape_cast %48 : vector<2x1xf32> to vector<2x1xf32>
    %55 = vector.broadcast %54 : vector<2x1xf32> to vector<2x128xf32>
    %56 = vector.broadcast %cst_38 : f32 to vector<2x128xf32>
    %57 = arith.select %53, %55, %56 : vector<2x128xi1>, vector<2x128xf32>
    %58 = vector.shape_cast %44 : vector<2x1xf32> to vector<2x1xf32>
    %59 = vector.broadcast %58 : vector<2x1xf32> to vector<2x128xf32>
    %60 = arith.select %51, %59, %57 : vector<2x128xi1>, vector<2x128xf32>
    %c0_39 = arith.constant 0 : index
    %c0_40 = arith.constant 0 : index
    %61 = vector.load %arg9[%c0_39, %c0_40] : memref<2x128xf32, #tpu.memory_space<vmem>>, vector<2x128xf32>
    tpu.vector_store %arg9[%c0_39, %c0_40], %60 {strides = array<i32>} : memref<2x128xf32, #tpu.memory_space<vmem>>, vector<2x128xf32>,
    return
  }
  func.func @transform_0(%arg0: i32) -> (i32, i32) {
    %c0_i32 = arith.constant 0 : i32
    %c0_i32_0 = arith.constant 0 : i32
    return %arg0, %c0_i32 : i32, i32
  }
  func.func @transform_1(%arg0: i32) -> (i32, i32, i32) {
    %c0_i32 = arith.constant 0 : i32
    %c0_i32_0 = arith.constant 0 : i32
    %c0_i32_1 = arith.constant 0 : i32
    return %arg0, %c0_i32, %c0_i32_0 : i32, i32, i32
  }
  func.func @transform_2(%arg0: i32) -> (i32, i32, i32) {
    %c0_i32 = arith.constant 0 : i32
    %c0_i32_0 = arith.constant 0 : i32
    %c0_i32_1 = arith.constant 0 : i32
    return %arg0, %c0_i32, %c0_i32_0 : i32, i32, i32
  }
  func.func @transform_3(%arg0: i32) -> (i32, i32) {
    %c0_i32 = arith.constant 0 : i32
    %c0_i32_0 = arith.constant 0 : i32
    return %arg0, %c0_i32 : i32, i32
  }
  func.func @transform_4(%arg0: i32) -> (i32, i32) {
    %c0_i32 = arith.constant 0 : i32
    %c0_i32_0 = arith.constant 0 : i32
    %c0_i32_1 = arith.constant 0 : i32
    return %c0_i32, %c0_i32_0 : i32, i32
  }
  func.func @transform_5(%arg0: i32) -> (i32, i32) {
    %c0_i32 = arith.constant 0 : i32
    %c0_i32_0 = arith.constant 0 : i32
    %c0_i32_1 = arith.constant 0 : i32
    return %c0_i32, %c0_i32_0 : i32, i32
  }
  func.func @transform_6(%arg0: i32) -> (i32, i32) {
    %c0_i32 = arith.constant 0 : i32
    %c0_i32_0 = arith.constant 0 : i32
    %c0_i32_1 = arith.constant 0 : i32
    return %c0_i32, %c0_i32_0 : i32, i32
  }
  func.func @transform_7(%arg0: i32) -> (i32, i32) {
    %c0_i32 = arith.constant 0 : i32
    %c0_i32_0 = arith.constant 0 : i32
    %c0_i32_1 = arith.constant 0 : i32
    return %c0_i32, %c0_i32_0 : i32, i32
  }
  func.func @transform_8(%arg0: i32) -> (i32, i32) {
    %c0_i32 = arith.constant 0 : i32
    %c0_i32_0 = arith.constant 0 : i32
    return %arg0, %c0_i32 : i32, i32
  }
}

</mosaic_0001>

<bundles_post_ra>
// kernel: tpu_custom_call.1
= control target key start
LH: loop header
LB: loop body
LE: loop exit
PB: predicated region body
PF: predicated region fallthrough
CT: control target
= control target key end

     0   :  { %v407_v1 = vmov 0   ;;  %s548_s0 = inlined_call_operand.vmem [shape: f32[2,128], index: 0, kind: input, shape index: {}]   ;;  %s549_s1 = inlined_call_operand.vmem [shape: f32[2,16,32], index: 1, kind: input, shape index: {}]   ;;  %s550_s2 = inlined_call_operand.vmem [shape: f32[2,8,32], index: 2, kind: input, shape index: {}]   ;;  %s551_s3 = inlined_call_operand.vmem [shape: f32[2,128], index: 3, kind: input, shape index: {}]   ;;  %s552_s4 = inlined_call_operand.vmem [shape: bf16[32,128], index: 4, kind: input, shape index: {}]   ;;  %s553_s5 = inlined_call_operand.vmem [shape: f32[1,128], index: 5, kind: input, shape index: {}]   ;;  %s554_s6 = inlined_call_operand.vmem [shape: bf16[128,32], index: 6, kind: input, shape index: {}]   ;;  %s555_s7 = inlined_call_operand.vmem [shape: f32[1,32], index: 7, kind: input, shape index: {}]   ;;  %s556_s8 = inlined_call_operand.hbm [shape: f32[2,128], index: 8, kind: output, shape index: {}]  }
   0x1   :  { %v31_v0 = vld [vmem:[%s548_s0] sm:$0x3]  ;;  %375 = vset.pattern.permute.xlu0 %v407_v1  ;;  %377 = vset.pattern.permute.xlu1 %v407_v1 }
   0x2   :  { %v45_v2 = vperm.slane %v31_v0, 0  ;;  %v33_v3 = vrot.slane %v31_v0, 1 }
   0x3   :  { %13 = vsyncpa [#allocation4], 0  ;;  %v408_v5 = vmov 1   ;;  %v461_v6 = vld [vmem:[%s549_s1 + $0x8] sm:$0xff]  ;;  %vm38_vm0 = vcmask 261120   ;;  %v466_v7 = vld [vmem:[%s549_s1 + $0x18] sm:$0xff] }
   0x4   :  { %48 = vperm.xlu0 %375, %v45_v2   ;;  %v46_v4 = vperm.slane %v33_v3, 0  ;;  %40 = vst.msk [vmem:[#allocation2 + $0x8] sm:$0xff] %vm38_vm0, %v461_v6  ;;  %v475_v8 = vld [vmem:[%s549_s1] sm:$0xff]  ;;  %v355_v9 = vld [vmem:[%s552_s4 + $0x8] sm:$0xff]  ;;  %v488_v11 = vld [vmem:[%s549_s1 + $0x10] sm:$0xff]  ;;  %vm286_vm1 = vcmask 1041409  }
   0x5   :  { %42 = vst.msk [vmem:[#allocation2 + $0x18] sm:$0xff] %vm38_vm0, %v466_v7  ;;  %107 = vmatpush.bf16.msra.mxu0 %v355_v9  ;;  %v354_v10 = vld [vmem:[%s552_s4] sm:$0xff]  ;;  %v363_v15 = vld [vmem:[%s554_s6 + $0x38] sm:$0xff]  ;;  %v58_v17 = vld [vmem:[%s550_s2 + $0x8] sm:$0xff]  ;;  %s303_s18 = sshll.u32 %s556_s8, 4  ;;  %s304_s18 = int_to_ptr.hbm [resolvable:$true] %s303_s18 }
   0x6   :  { %52 = vperm.xlu1 %377, %v46_v4   ;;  %39 = vst.msk [vmem:[#allocation2] sm:$0xff] %vm38_vm0, %v475_v8  ;;  %v57_v14 = vld [vmem:[%s550_s2] sm:$0xff]  ;;  %213 = vmatpush.bf16.msra.mxu1 %v363_v15  ;;  %v362_v21 = vld [vmem:[%s554_s6 + $0x30] sm:$0xff]  ;;  %v361_v26 = vld [vmem:[%s554_s6 + $0x28] sm:$0xff] }
   0x7   :  { %41 = vst.msk [vmem:[#allocation2 + $0x10] sm:$0xff] %vm38_vm0, %v488_v11  ;;  %364 = vmatpush.bf16.msra.mxu2 %v363_v15  ;;  %v360_v27 = vld [vmem:[%s554_s6 + $0x20] sm:$0xff]  ;;  %v359_v34 = vld [vmem:[%s554_s6 + $0x18] sm:$0xff]  ;;  %v358_v35 = vld [vmem:[%s554_s6 + $0x10] sm:$0xff] }
   0x8   :  { %v357_v36 = vld [vmem:[%s554_s6 + $0x8] sm:$0xff]  ;;  %v356_v37 = vld [vmem:[%s554_s6] sm:$0xff]  ;;  %s409_s6 = smov [#allocation3]  }
   0x9   :  { %108 = vmatpush.bf16.msra.mxu0 %v354_v10  ;;  %v379_v39 = vld [vmem:[%s553_s5] ss:$0 sm:$0xff] }
   0xa   :  { %214 = vmatpush.bf16.msra.mxu1 %v362_v21  ;;  %v128_v40 = vld [vmem:[%s551_s3] sm:$0x3] }
   0xb   :  { %365 = vmatpush.bf16.msra.mxu2 %v362_v21  ;;  %v131_v42 = vperm.slane %v128_v40, 0  ;;  %v130_v51 = vrot.slane %v128_v40, 1  ;;  %v380_v61 = vld [vmem:[%s555_s7] ss:$0 sm:$0xff]  ;;  %s301_s7 = sshll.u32 %s409_s6, 4  ;;  %s302_s7 = int_to_ptr.vmem [resolvable:$true] %s301_s7 }
   0xc   :  { %376 = vset.pattern.permute.xlu0 %v408_v5 }
   0xd   :  { %60 = vperm.xlu0 %376, %v45_v2   ;;  %v73_v28 = vld [vmem:[#allocation2] sm:$0xff]  ;;  %v132_v53 = vperm.slane %v130_v51, 0 }
   0xe   :  { %378 = vset.pattern.permute.xlu1 %v408_v5  ;;  %215 = vmatpush.bf16.msra.mxu1 %v361_v26  ;;  %v75_v31 = vld [vmem:[#allocation2 + $0x10] sm:$0xff] }
   0xf   :  { %64 = vperm.xlu1 %378, %v46_v4   ;;  %366 = vmatpush.bf16.msra.mxu2 %v361_v26 }
  0x12   :  { %216 = vmatpush.bf16.msra.mxu1 %v360_v27 }
  0x13   :  { %367 = vmatpush.bf16.msra.mxu2 %v360_v27 }
  0x16   :  { %217 = vmatpush.bf16.msra.mxu1 %v359_v34 }
  0x17   :  { %368 = vmatpush.bf16.msra.mxu2 %v359_v34 }
  0x1a   :  { %218 = vmatpush.bf16.msra.mxu1 %v358_v35 }
  0x1b   :  { %369 = vmatpush.bf16.msra.mxu2 %v358_v35  ;;  %v280_v35 = vlaneseq }
  0x1e   :  { %219 = vmatpush.bf16.msra.mxu1 %v357_v36 }
  0x1f   :  { %370 = vmatpush.bf16.msra.mxu2 %v357_v36 }
  0x22   :  { %220 = vmatpush.bf16.msra.mxu1 %v356_v37 }
  0x23   :  { %371 = vmatpush.bf16.msra.mxu2 %v356_v37 }
  0x76   :  { %v49_v12 = vpop.permute.xlu0 %48 }
  0x77   :  { %v55_v18 = vmul.f32 %v49_v12, %v461_v6 }
  0x78   :  { %v53_v13 = vpop.permute.xlu1 %52 }
  0x79   :  { %v56_v19 = vmul.f32 %v53_v13, %v466_v7 }
  0x7f   :  { %v61_v16 = vpop.permute.xlu0 %60 }
  0x80   :  { %v67_v20 = vmul.f32 %v61_v16, %v57_v14 }
  0x81   :  { %v65_v22 = vpop.permute.xlu1 %64 }
  0x82   :  { %v69_v23 = vadd.f32 %v67_v20, %v55_v18  ;;  %v68_v24 = vmul.f32 %v65_v22, %v58_v17 }
  0x84   :  { %71 = vst.msk [vmem:[#allocation2 + $0x8] sm:$0xff] %vm38_vm0, %v69_v23  ;;  %v70_v25 = vadd.f32 %v68_v24, %v56_v19 }
  0x86   :  { %72 = vst.msk [vmem:[#allocation2 + $0x18] sm:$0xff] %vm38_vm0, %v70_v25 }
  0x8b   :  { %v74_v29 = vld [vmem:[#allocation2 + $0x8] sm:$0xff] }
  0x8c   :  { %v77_v30 = vpack.c.bf16 %v74_v29, %v73_v28 }
  0x8d   :  { %v76_v32 = vld [vmem:[#allocation2 + $0x18] sm:$0xff] }
  0x8e   :  { %320 = vmatmul.msk.bf16.vlgmr.msra.gmra.mxu0 %vm38_vm0, %v77_v30  ;;  %v78_v33 = vpack.c.bf16 %v76_v32, %v75_v31 }
  0x9e   :  { %321 = vmatmul.msk.bf16.gmra.mxu0 %vm38_vm0, %v78_v33 }
 0x10b   :  { %v110_v38 = vpop.f32.mrf.mxu0 }
 0x10c   :  { %v124_v41 = vadd.f32 %v379_v39, %v110_v38 }
 0x10e   :  { %v135_v44 = vadd.f32 %v131_v42, %v124_v41  ;;  %v281_v41 = vand.u32 127, %v280_v35 }
 0x110   :  { %v139_v47 = vmax.f32 %v135_v44, 0.0  ;;  %vm283_vm2 = vcmp.eq.s32.totalorder %v281_v41, 1  ;;  %vm282_vm3 = vcmp.eq.s32.totalorder %v281_v41, 0 }
 0x113   :  { %v112_v43 = vpop.f32.mrf.mxu0 }
 0x114   :  { %v125_v45 = vadd.f32 %v379_v39, %v112_v43 }
 0x116   :  { %v136_v46 = vadd.f32 %v131_v42, %v125_v45 }
 0x118   :  { %v140_v48 = vmax.f32 %v136_v46, 0.0 }
 0x11a   :  { %v143_v49 = vpack.c.bf16 %v140_v48, %v139_v47 }
 0x11b   :  { %v115_v50 = vpop.f32.mrf.mxu0 }
 0x11c   :  { %221 = vmatmul.bf16.vlgmr.msra.gmra.mxu1 %v143_v49  ;;  %v126_v52 = vadd.f32 %v379_v39, %v115_v50 }
 0x11e   :  { %v137_v55 = vadd.f32 %v132_v53, %v126_v52 }
 0x120   :  { %v141_v58 = vmax.f32 %v137_v55, 0.0 }
 0x123   :  { %v117_v54 = vpop.f32.mrf.mxu0 }
 0x124   :  { %v127_v56 = vadd.f32 %v379_v39, %v117_v54 }
 0x126   :  { %v138_v57 = vadd.f32 %v132_v53, %v127_v56 }
 0x128   :  { %v142_v59 = vmax.f32 %v138_v57, 0.0 }
 0x12a   :  { %v144_v60 = vpack.c.bf16 %v142_v59, %v141_v58 }
 0x12c   :  { %226 = vmatmul.bf16.vlgmr.msra.gmra.mxu2 %v144_v60 }
 0x199   :  { %v222_v62 = vpop.f32.mrf.mxu1 }
 0x19a   :  { %v223_v63 = vadd.f32 %v380_v61, %v222_v62 }
 0x19c   :  { %v236_v0 = vsub.f32 %v223_v63, %v475_v8 }
 0x19e   :  { %v240_v1 = vand.u32 2147483647, %v236_v0 }
 0x1a0   :  { %v244_v2 = vsel %vm38_vm0, %v240_v1, 0.0 }
 0x1a1   :  { %v224_v3 = vpop.f32.mrf.mxu1  ;;  %245 = vadd.xlane.f32.xlu1 %v244_v2 }
 0x1a2   :  { %v225_v4 = vadd.f32 %v380_v61, %v224_v3 }
 0x1a4   :  { %v237_v5 = vsub.f32 %v225_v4, %v461_v6 }
 0x1a6   :  { %v241_v9 = vand.u32 2147483647, %v237_v5 }
 0x1a8   :  { %v262_v10 = vsel %vm38_vm0, %v241_v9, 0.0 }
 0x1a9   :  { %263 = vadd.xlane.f32.xlu2 %v262_v10 }
 0x1af   :  { %v227_v12 = vpop.f32.mrf.mxu2 }
 0x1b0   :  { %v228_v15 = vadd.f32 %v380_v61, %v227_v12 }
 0x1b2   :  { %v238_v8 = vsub.f32 %v228_v15, %v488_v11 }
 0x1b4   :  { %v242_v19 = vand.u32 2147483647, %v238_v8 }
 0x1b6   :  { %v247_v20 = vsel %vm38_vm0, %v242_v19, 0.0 }
 0x1b7   :  { %v229_v13 = vpop.f32.mrf.mxu2 }
 0x1b8   :  { %v230_v14 = vadd.f32 %v380_v61, %v229_v13 }
 0x1ba   :  { %v239_v16 = vsub.f32 %v230_v14, %v466_v7 }
 0x1bc   :  { %v243_v17 = vand.u32 2147483647, %v239_v16 }
 0x1be   :  { %v265_v18 = vsel %vm38_vm0, %v243_v17, 0.0 }
 0x1bf   :  { %266 = vadd.xlane.f32.xlu2 %v265_v18 }
 0x1c7   :  { %248 = vadd.xlane.f32.xlu2 %v247_v20 }
 0x214   :  { %v246_v21 = vpop.xlane.xlu1 %245 }
 0x215   :  { %v250_v23 = vrot.slane %v246_v21, 4 }
 0x217   :  { %v251_v27 = vadd.f32 %v250_v23, %v246_v21 }
 0x219   :  { %v252_v30 = vrot.slane %v251_v27, 2 }
 0x21b   :  { %v253_v36 = vadd.f32 %v252_v30, %v251_v27 }
 0x21c   :  { %v264_v6 = vpop.xlane.xlu2 %263 }
 0x21d   :  { %v268_v22 = vrot.slane %v264_v6, 4  ;;  %v254_v42 = vrot.slane %v253_v36, 1 }
 0x21f   :  { %v269_v24 = vadd.f32 %v268_v22, %v264_v6  ;;  %v255_v47 = vadd.f32 %v254_v42, %v253_v36 }
 0x221   :  { %v270_v7 = vrot.slane %v269_v24, 2 }
 0x223   :  { %v271_v31 = vadd.f32 %v270_v7, %v269_v24 }
 0x225   :  { %v272_v38 = vrot.slane %v271_v31, 1 }
 0x227   :  { %v273_v44 = vadd.f32 %v272_v38, %v271_v31 }
 0x232   :  { %v267_v25 = vpop.xlane.xlu2 %266 }
 0x233   :  { %v274_v26 = vrot.slane %v267_v25, 4 }
 0x235   :  { %v275_v28 = vadd.f32 %v274_v26, %v267_v25 }
 0x237   :  { %v276_v29 = vrot.slane %v275_v28, 2 }
 0x239   :  { %v277_v11 = vadd.f32 %v276_v29, %v275_v28 }
 0x23a   :  { %v249_v32 = vpop.xlane.xlu2 %248 }
 0x23b   :  { %v256_v33 = vrot.slane %v249_v32, 4  ;;  %v278_v34 = vrot.slane %v277_v11, 1 }
 0x23d   :  { %v257_v37 = vadd.f32 %v256_v33, %v249_v32  ;;  %v279_v40 = vadd.f32 %v278_v34, %v277_v11 }
 0x23f   :  { %v258_v39 = vrot.slane %v257_v37, 2  ;;  %v287_v46 = vsel %vm286_vm1, %v279_v40, %v273_v44 }
 0x240   :  { %v289_v49 = vsel %vm283_vm2, %v287_v46, 0.0 }
 0x241   :  { %v259_v43 = vadd.f32 %v258_v39, %v257_v37 }
 0x243   :  { %v260_v45 = vrot.slane %v259_v43, 1 }
 0x245   :  { %v261_v48 = vadd.f32 %v260_v45, %v259_v43 }
 0x247   :  { %v292_v50 = vsel %vm286_vm1, %v261_v48, %v255_v47 }
 0x248   :  { %v294_v51 = vsel %vm282_vm3, %v292_v50, %v289_v49 }
 0x249   :  { %295 = vst [vmem:[#allocation3] sm:$0x3] %v294_v51 }
 0x24a   :  { %306 = dma.vmem_to_hbm [thread:$0]  %s302_s7, 32, %s304_s18, [#allocation4]  }
 0x24b   :  { %405 = dma.done.wait [#allocation4], 32  }
 0x24c   :  { %406 = vsyncadd [#allocation4], 4294967264 }
 0x24d   :  { %311 = vsyncpa [#allocation4], 1 }

</bundles_post_ra>
